<compile_context>
chip_gen: v7x
topology: tpu7x:2x2x1
jax: 0.10.0
libtpu: 0.0.40
codegen_flags: <defaults>
</compile_context>

<pallas_src>
import jax
import jax.numpy as jnp
from jax.experimental import pallas as pl
from jax.experimental.pallas import tpu as pltpu

TILE_B_MAX = 1024  # keeps double-buffered batch tiles well inside v7x's 64 MiB VMEM.


def _round_up(x, m):
    return ((x + m - 1) // m) * m


# ----------------------------------------------------------------------------
# Pallas kernel: fused MLP (linear+relu chain) + wide/deep output linear.
# refs layout: deep_in, wide_in, [W_i, b_i]*n_hidden, W_deep, W_wide, b_out, out
# ----------------------------------------------------------------------------
def _make_deep_wide_kernel(n_hidden):
    def kernel(*refs):
        deep_ref, wide_ref = refs[0], refs[1]
        idx = 2
        h = deep_ref[...]  # bf16 activations
        for _ in range(n_hidden):
            w_ref, b_ref = refs[idx], refs[idx + 1]
            idx += 2
            acc = jnp.dot(h, w_ref[...], preferred_element_type=jnp.float32)
            acc = acc + b_ref[...]                           # bias add + ReLU in f32
            h = jnp.maximum(acc, 0.0).astype(jnp.bfloat16)   # downcast only for next MXU pass
        wd_ref, ww_ref, bo_ref = refs[idx], refs[idx + 1], refs[idx + 2]
        out_ref = refs[idx + 3]
        out_ref[...] = (
            jnp.dot(h, wd_ref[...], preferred_element_type=jnp.float32)
            + jnp.dot(wide_ref[...], ww_ref[...], preferred_element_type=jnp.float32)
            + bo_ref[...]
        )

    return kernel


# ----------------------------------------------------------------------------
# Parameter init (deterministic, mirrors the nn.Module __init__ shapes).
# Kernel-ready copies (bf16 weights, (1,h) f32 biases) are cached once here.
# ----------------------------------------------------------------------------
def prepare_kernel_params(params):
    hid = [
        (w.astype(jnp.bfloat16), b.reshape(1, -1).astype(jnp.float32))
        for w, b in params["hidden"]
    ]
    return dict(
        hidden=hid,
        out_deep=params["out_deep"].astype(jnp.bfloat16),
        out_wide=params["out_wide"].astype(jnp.bfloat16),
        out_bias=params["out_bias"].reshape(1, -1).astype(jnp.float32),
    )


def init_params(cfg, key):
    keys = iter(jax.random.split(key, 64))
    emb_tables = []
    for _col, vocab, dim in cfg["embeddings_input"]:
        t = jax.random.normal(next(keys), (vocab, dim), jnp.float32) * 0.1
        t = t.at[0].set(0.0)  # nn.Embedding(padding_idx=0)
        emb_tables.append(t)

    d_in = sum(d for _, _, d in cfg["embeddings_input"]) + len(cfg["continuous_cols"])
    hidden = []
    prev = d_in
    for h in cfg["hidden_layers"]:
        w = jax.random.normal(next(keys), (prev, h), jnp.float32) * 0.1
        b = jax.random.normal(next(keys), (h,), jnp.float32) * 0.1
        hidden.append((w, b))
        prev = h

    n_wide = len(cfg["wide_cols"])
    out_deep = jax.random.normal(next(keys), (prev, cfg["n_class"]), jnp.float32) * 0.1
    out_wide = jax.random.normal(next(keys), (n_wide, cfg["n_class"]), jnp.float32) * 0.1
    out_bias = jax.random.normal(next(keys), (cfg["n_class"],), jnp.float32) * 0.1
    params = dict(
        emb_tables=emb_tables,
        hidden=hidden,
        out_deep=out_deep,
        out_wide=out_wide,
        out_bias=out_bias,
    )
    params["kernel"] = prepare_kernel_params(params)  # cached, not re-padded per call
    return params


# ----------------------------------------------------------------------------
# Glue (embedding gather, column select) + batch-tiled pallas_call.
# ----------------------------------------------------------------------------
def _gather_inputs(X, params, cfg):
    # Categorical ids travel as float32 columns (exact up to 2^24 vocab entries).
    emb_parts = []
    for (col, _, _), table in zip(cfg["embeddings_input"], params["emb_tables"]):
        ids = X[:, cfg["column_idx"][col]].astype(jnp.int32)
        emb_parts.append(table[ids])
    cont_idx = [cfg["column_idx"][c] for c in cfg["continuous_cols"]]
    deep_inp = jnp.concatenate(
        emb_parts + [X[:, cont_idx].astype(jnp.float32)], axis=1
    )
    wide_idx = [cfg["column_idx"][c] for c in cfg["wide_cols"]]
    X_w = X[:, wide_idx].astype(jnp.float32)
    return deep_inp, X_w


def deep_wide_forward(X, params, cfg):
    # TODO(synk): dropout layers are identity at inference (eval); omitted.
    # TODO(synk): embedding gather / column select stays in XLA glue (tables are tiny);
    #             could be fused in-kernel with scalar-prefetched ids if it ever matters.
    deep_inp, X_w = _gather_inputs(X, params, cfg)
    kp = params["kernel"]

    B = X.shape[0]
    d_deep = deep_inp.shape[1]
    n_wide = X_w.shape[1]
    n_class = cfg["n_class"]
    n_hidden = len(cfg["hidden_layers"])

    tile_b = min(TILE_B_MAX, _round_up(B, 8))
    Bp = _round_up(B, tile_b)
    grid = (Bp // tile_b,)

    # Native-width activations (no 128-lane padding in HBM), bf16 operands.
    deep_p = jnp.pad(deep_inp, ((0, Bp - B), (0, 0))).astype(jnp.bfloat16)
    wide_p = jnp.pad(X_w, ((0, Bp - B), (0, 0))).astype(jnp.bfloat16)

    batch_map = lambda i: (i, 0)     # batch-tiled operands
    const2 = lambda i: (0, 0)        # weights/biases stay VMEM-resident across tiles

    ops = [deep_p, wide_p]
    specs = [
        pl.BlockSpec((tile_b, d_deep), batch_map),
        pl.BlockSpec((tile_b, n_wide), batch_map),
    ]
    for w, b in kp["hidden"]:
        ops += [w, b]
        specs += [pl.BlockSpec(w.shape, const2), pl.BlockSpec(b.shape, const2)]
    ops += [kp["out_deep"], kp["out_wide"], kp["out_bias"]]
    specs += [
        pl.BlockSpec(kp["out_deep"].shape, const2),
        pl.BlockSpec(kp["out_wide"].shape, const2),
        pl.BlockSpec(kp["out_bias"].shape, const2),
    ]

    # Rough VMEM budget: double-buffered batch tiles + resident weights + slack.
    io_bytes = tile_b * (2 * d_deep + 2 * n_wide + 4 * n_class) * 2
    w_bytes = sum(w.size * 2 + b.size * 4 for w, b in kp["hidden"])
    w_bytes += kp["out_deep"].size * 2 + kp["out_wide"].size * 2 + kp["out_bias"].size * 4
    vmem_limit = int(min(48 * 1024 * 1024, max(4 * 1024 * 1024, 4 * (io_bytes + w_bytes))))

    out_padded = pl.pallas_call(
        _make_deep_wide_kernel(n_hidden),
        grid=grid,
        out_shape=jax.ShapeDtypeStruct((Bp, n_class), jnp.float32),
        in_specs=specs,
        out_specs=pl.BlockSpec((tile_b, n_class), batch_map),
        compiler_params=pltpu.CompilerParams(
            dimension_semantics=("parallel",),
            vmem_limit_bytes=vmem_limit,
        ),
    )(*ops)
    return out_padded[:B]


# ----------------------------------------------------------------------------
# Pure-JAX reference (mirrors the PyTorch forward exactly, f32 throughout).
# ----------------------------------------------------------------------------
def reference_forward(X, params, cfg):
    deep_inp, X_w = _gather_inputs(X, params, cfg)
    h = deep_inp
    for w, b in params["hidden"]:
        h = jnp.maximum(h @ w + b, 0.0)
    return h @ params["out_deep"] + X_w @ params["out_wide"] + params["out_bias"]


if __name__ == "__main__":
    cfg = dict(
        embeddings_input=[("ceduc", 10, 4), ("coccup", 8, 4), ("crelat", 6, 8)],
        column_idx={
            "ceduc": 0,
            "coccup": 1,
            "crelat": 2,
            "age": 3,
            "hours": 4,
            "capgain": 5,
        },
        continuous_cols=["age", "hours"],
        categary_cols=["ceduc", "coccup", "crelat"],
        wide_cols=["coccup", "age", "capgain"],
        hidden_layers=[32, 16],
        dropout=(),
        n_class=4,
    )

    key = jax.random.PRNGKey(0)
    k_param, k_cat, k_cont = jax.random.split(key, 3)
    params = init_params(cfg, k_param)

    batch = 8
    n_cols = 6
    # categorical id columns (as floats) + continuous columns.
    cat_ids = jnp.stack(
        [
            jax.random.randint(jax.random.fold_in(k_cat, i), (batch,), 0, vocab)
            for i, (_, vocab, _) in enumerate(cfg["embeddings_input"])
        ],
        axis=1,
    ).astype(jnp.float32)
    cont_vals = jax.random.normal(k_cont, (batch, n_cols - 3), jnp.float32)
    X = jnp.concatenate([cat_ids, cont_vals], axis=1)  # (8, 6)

    out = deep_wide_forward(X, params, cfg)
    out = jax.block_until_ready(out)

    ref = reference_forward(X, params, cfg)
    assert out.shape == (batch, cfg["n_class"])
    # bf16 matmul operands (f32 accumulation) -> loosened tolerance vs the f32 reference.
    assert jnp.allclose(out, ref, atol=5e-2, rtol=5e-2), "mismatch vs reference"
    print("KERNEL_OK")
</pallas_src>

<mosaic_0001>
module attributes {stable_mosaic.version = 11 : i64} {
  func.func @kernel(%arg0: i32, %arg1: memref<8x18xbf16, #tpu.memory_space<vmem>>, %arg2: memref<8x3xbf16, #tpu.memory_space<vmem>>, %arg3: memref<18x32xbf16, #tpu.memory_space<vmem>>, %arg4: memref<1x32xf32, #tpu.memory_space<vmem>>, %arg5: memref<32x16xbf16, #tpu.memory_space<vmem>>, %arg6: memref<1x16xf32, #tpu.memory_space<vmem>>, %arg7: memref<16x4xbf16, #tpu.memory_space<vmem>>, %arg8: memref<3x4xbf16, #tpu.memory_space<vmem>>, %arg9: memref<1x4xf32, #tpu.memory_space<vmem>>, %arg10: memref<8x4xf32, #tpu.memory_space<vmem>>) attributes {dimension_semantics = [#tpu.dimension_semantics<parallel>], iteration_bounds = array<i64: 1>, scalar_prefetch = 0 : i64, scratch_operands = 0 : i64, tpu.core_type = #tpu.core_type<tc>, window_params = [{transform_indices = @transform_0, window_bounds = array<i64: 8, 18>}, {transform_indices = @transform_1, window_bounds = array<i64: 8, 3>}, {pipeline_mode = #tpu.pipeline_mode<synchronous>, transform_indices = @transform_2, window_bounds = array<i64: 18, 32>}, {pipeline_mode = #tpu.pipeline_mode<synchronous>, transform_indices = @transform_3, window_bounds = array<i64: 1, 32>}, {pipeline_mode = #tpu.pipeline_mode<synchronous>, transform_indices = @transform_4, window_bounds = array<i64: 32, 16>}, {pipeline_mode = #tpu.pipeline_mode<synchronous>, transform_indices = @transform_5, window_bounds = array<i64: 1, 16>}, {pipeline_mode = #tpu.pipeline_mode<synchronous>, transform_indices = @transform_6, window_bounds = array<i64: 16, 4>}, {pipeline_mode = #tpu.pipeline_mode<synchronous>, transform_indices = @transform_7, window_bounds = array<i64: 3, 4>}, {pipeline_mode = #tpu.pipeline_mode<synchronous>, transform_indices = @transform_8, window_bounds = array<i64: 1, 4>}, {transform_indices = @transform_9, window_bounds = array<i64: 8, 4>}]} {
    %c0 = arith.constant 0 : index
    %c0_0 = arith.constant 0 : index
    %0 = vector.load %arg1[%c0, %c0_0] : memref<8x18xbf16, #tpu.memory_space<vmem>>, vector<8x18xbf16>
    %c0_1 = arith.constant 0 : index
    %c0_2 = arith.constant 0 : index
    %1 = vector.load %arg3[%c0_1, %c0_2] : memref<18x32xbf16, #tpu.memory_space<vmem>>, vector<18x32xbf16>
    %cst = arith.constant dense<0.000000e+00> : vector<8x32xf32>
    %2 = tpu.matmul %0, %1, %cst {dimension_numbers = #tpu.dot_dimension_numbers<[1], [0], [0], [1], [0, 0, 1, 1], [], []>} : vector<8x18xbf16>, vector<18x32xbf16>, vector<8x32xf32> -> vector<8x32xf32>
    %c0_3 = arith.constant 0 : index
    %c0_4 = arith.constant 0 : index
    %3 = vector.load %arg4[%c0_3, %c0_4] : memref<1x32xf32, #tpu.memory_space<vmem>>, vector<1x32xf32>
    %4 = vector.broadcast %3 : vector<1x32xf32> to vector<8x32xf32>
    %5 = arith.addf %2, %4 : vector<8x32xf32>
    %cst_5 = arith.constant 0.000000e+00 : f32
    %6 = vector.broadcast %cst_5 : f32 to vector<8x32xf32>
    %7 = arith.maximumf %5, %6 : vector<8x32xf32>
    %8 = arith.truncf %7 : vector<8x32xf32> to vector<8x32xbf16>
    %c0_6 = arith.constant 0 : index
    %c0_7 = arith.constant 0 : index
    %9 = vector.load %arg5[%c0_6, %c0_7] : memref<32x16xbf16, #tpu.memory_space<vmem>>, vector<32x16xbf16>
    %cst_8 = arith.constant dense<0.000000e+00> : vector<8x16xf32>
    %10 = tpu.matmul %8, %9, %cst_8 {dimension_numbers = #tpu.dot_dimension_numbers<[1], [0], [0], [1], [0, 0, 1, 1], [], []>} : vector<8x32xbf16>, vector<32x16xbf16>, vector<8x16xf32> -> vector<8x16xf32>
    %c0_9 = arith.constant 0 : index
    %c0_10 = arith.constant 0 : index
    %11 = vector.load %arg6[%c0_9, %c0_10] : memref<1x16xf32, #tpu.memory_space<vmem>>, vector<1x16xf32>
    %12 = vector.broadcast %11 : vector<1x16xf32> to vector<8x16xf32>
    %13 = arith.addf %10, %12 : vector<8x16xf32>
    %cst_11 = arith.constant 0.000000e+00 : f32
    %14 = vector.broadcast %cst_11 : f32 to vector<8x16xf32>
    %15 = arith.maximumf %13, %14 : vector<8x16xf32>
    %16 = arith.truncf %15 : vector<8x16xf32> to vector<8x16xbf16>
    %c0_12 = arith.constant 0 : index
    %c0_13 = arith.constant 0 : index
    %17 = vector.load %arg7[%c0_12, %c0_13] : memref<16x4xbf16, #tpu.memory_space<vmem>>, vector<16x4xbf16>
    %cst_14 = arith.constant dense<0.000000e+00> : vector<8x4xf32>
    %18 = tpu.matmul %16, %17, %cst_14 {dimension_numbers = #tpu.dot_dimension_numbers<[1], [0], [0], [1], [0, 0, 1, 1], [], []>} : vector<8x16xbf16>, vector<16x4xbf16>, vector<8x4xf32> -> vector<8x4xf32>
    %c0_15 = arith.constant 0 : index
    %c0_16 = arith.constant 0 : index
    %19 = vector.load %arg2[%c0_15, %c0_16] : memref<8x3xbf16, #tpu.memory_space<vmem>>, vector<8x3xbf16>
    %c0_17 = arith.constant 0 : index
    %c0_18 = arith.constant 0 : index
    %20 = vector.load %arg8[%c0_17, %c0_18] : memref<3x4xbf16, #tpu.memory_space<vmem>>, vector<3x4xbf16>
    %cst_19 = arith.constant dense<0.000000e+00> : vector<8x4xf32>
    %21 = tpu.matmul %19, %20, %cst_19 {dimension_numbers = #tpu.dot_dimension_numbers<[1], [0], [0], [1], [0, 0, 1, 1], [], []>} : vector<8x3xbf16>, vector<3x4xbf16>, vector<8x4xf32> -> vector<8x4xf32>
    %22 = arith.addf %18, %21 : vector<8x4xf32>
    %c0_20 = arith.constant 0 : index
    %c0_21 = arith.constant 0 : index
    %23 = vector.load %arg9[%c0_20, %c0_21] : memref<1x4xf32, #tpu.memory_space<vmem>>, vector<1x4xf32>
    %24 = vector.broadcast %23 : vector<1x4xf32> to vector<8x4xf32>
    %25 = arith.addf %22, %24 : vector<8x4xf32>
    %c0_22 = arith.constant 0 : index
    %c0_23 = arith.constant 0 : index
    %26 = vector.load %arg10[%c0_22, %c0_23] : memref<8x4xf32, #tpu.memory_space<vmem>>, vector<8x4xf32>
    tpu.vector_store %arg10[%c0_22, %c0_23], %25 {strides = array<i32>} : memref<8x4xf32, #tpu.memory_space<vmem>>, vector<8x4xf32>,
    return
  }
  func.func @transform_0(%arg0: i32) -> (i32, i32) {
    %c0_i32 = arith.constant 0 : i32
    %c0_i32_0 = arith.constant 0 : i32
    return %arg0, %c0_i32 : i32, i32
  }
  func.func @transform_1(%arg0: i32) -> (i32, i32) {
    %c0_i32 = arith.constant 0 : i32
    %c0_i32_0 = arith.constant 0 : i32
    return %arg0, %c0_i32 : i32, i32
  }
  func.func @transform_2(%arg0: i32) -> (i32, i32) {
    %c0_i32 = arith.constant 0 : i32
    %c0_i32_0 = arith.constant 0 : i32
    %c0_i32_1 = arith.constant 0 : i32
    return %c0_i32, %c0_i32_0 : i32, i32
  }
  func.func @transform_3(%arg0: i32) -> (i32, i32) {
    %c0_i32 = arith.constant 0 : i32
    %c0_i32_0 = arith.constant 0 : i32
    %c0_i32_1 = arith.constant 0 : i32
    return %c0_i32, %c0_i32_0 : i32, i32
  }
  func.func @transform_4(%arg0: i32) -> (i32, i32) {
    %c0_i32 = arith.constant 0 : i32
    %c0_i32_0 = arith.constant 0 : i32
    %c0_i32_1 = arith.constant 0 : i32
    return %c0_i32, %c0_i32_0 : i32, i32
  }
  func.func @transform_5(%arg0: i32) -> (i32, i32) {
    %c0_i32 = arith.constant 0 : i32
    %c0_i32_0 = arith.constant 0 : i32
    %c0_i32_1 = arith.constant 0 : i32
    return %c0_i32, %c0_i32_0 : i32, i32
  }
  func.func @transform_6(%arg0: i32) -> (i32, i32) {
    %c0_i32 = arith.constant 0 : i32
    %c0_i32_0 = arith.constant 0 : i32
    %c0_i32_1 = arith.constant 0 : i32
    return %c0_i32, %c0_i32_0 : i32, i32
  }
  func.func @transform_7(%arg0: i32) -> (i32, i32) {
    %c0_i32 = arith.constant 0 : i32
    %c0_i32_0 = arith.constant 0 : i32
    %c0_i32_1 = arith.constant 0 : i32
    return %c0_i32, %c0_i32_0 : i32, i32
  }
  func.func @transform_8(%arg0: i32) -> (i32, i32) {
    %c0_i32 = arith.constant 0 : i32
    %c0_i32_0 = arith.constant 0 : i32
    %c0_i32_1 = arith.constant 0 : i32
    return %c0_i32, %c0_i32_0 : i32, i32
  }
  func.func @transform_9(%arg0: i32) -> (i32, i32) {
    %c0_i32 = arith.constant 0 : i32
    %c0_i32_0 = arith.constant 0 : i32
    return %arg0, %c0_i32 : i32, i32
  }
}

</mosaic_0001>

<bundles_post_ra>
// kernel: tpu_custom_call.1
= control target key start
LH: loop header
LB: loop body
LE: loop exit
PB: predicated region body
PF: predicated region fallthrough
CT: control target
= control target key end

     0   :  { %vm57_vm0 = vcmask 1040384   ;;  %vm180_vm1 = vcmask 1041408   ;;  %v348_v0 = vmov 0.0   ;;  %v349_v2 = vmov 65535   ;;  %s441_s2 = inlined_call_operand.vmem [shape: bf16[18,32], index: 2, kind: input, shape index: {}]   ;;  %s442_s7 = inlined_call_operand.vmem [shape: bf16[3,4], index: 7, kind: input, shape index: {}]   ;;  %s443_s0 = inlined_call_operand.vmem [shape: bf16[8,18], index: 0, kind: input, shape index: {}]   ;;  %s444_s4 = inlined_call_operand.vmem [shape: bf16[32,16], index: 4, kind: input, shape index: {}]   ;;  %s445_s6 = inlined_call_operand.vmem [shape: bf16[16,4], index: 6, kind: input, shape index: {}]   ;;  %s446_s3 = inlined_call_operand.vmem [shape: f32[1,32], index: 3, kind: input, shape index: {}]   ;;  %s447_s1 = inlined_call_operand.vmem [shape: bf16[8,3], index: 1, kind: input, shape index: {}]   ;;  %s448_s5 = inlined_call_operand.vmem [shape: f32[1,16], index: 5, kind: input, shape index: {}]   ;;  %s449_s8 = inlined_call_operand.vmem [shape: f32[1,4], index: 8, kind: input, shape index: {}]   ;;  %s450_s9 = inlined_call_operand.vmem [shape: f32[8,4], index: 9, kind: output, shape index: {}]  }
   0x1   :  { %312 = vmatprep.subr.bf16.mxu0 %v348_v0  ;;  %v343_v1 = vld [vmem:[%s441_s2] sm:$0xff]   ;;  %v181_v3 = vsel %vm57_vm0, 4294967295, %v349_v2  ;;  %320 = vmatprep.subr.bf16.mxu1 %v348_v0  ;;  %v344_v4 = vld [vmem:[%s441_s2 + $0x8] ss:$0 sps:$4 sm:$0x11]   ;;  %vm350_vm2 = vmmov 0  }
   0x2   :  { %313 = vmatpush3.bf16.msra.mxu0 %v343_v1  ;;  %v59_v5 = vsel %vm57_vm0, %v344_v4, 0  ;;  %v175_v6 = vld [vmem:[%s442_s7] sm:$0x3]  ;;  %v182_v7 = vsel %vm180_vm1, %v181_v3, 0  ;;  %316 = vmatprep.mubr.msk.bf16.mxu0 %vm350_vm2, %v348_v0  ;;  %vm53_vm3 = vcmask 146432   ;;  %v346_v11 = vld [vmem:[%s444_s4 + $0x8] sm:$0xff]  }
   0x3   :  { %314 = vmatprep.subr.bf16.mxu0 %v348_v0  ;;  %324 = vmatprep.mubr.msk.bf16.mxu1 %vm350_vm2, %v348_v0  ;;  %v184_v8 = vand.u32 %v182_v7, %v175_v6  ;;  %v33_v9 = vld [vmem:[%s443_s0] sm:$0xf]  ;;  %vm126_vm4 = vcmask 261120   ;;  %vm176_vm5 = vcmask 23552   ;;  %vm232_vm6 = vcmask 130048  }
   0x4   :  { %v345_v10 = vld [vmem:[%s444_s4] sm:$0xff]   ;;  %vm284_vm7 = vcmask 31744  }
   0x5   :  { %321 = vmatpush3.bf16.msra.mxu1 %v345_v10  ;;  %v290_v12 = vld [vmem:[%s446_s3] ss:$0 sm:$0xff] }
   0x6   :  { %315 = vmatpush3.bf16.msra.mxu0 %v59_v5  ;;  %322 = vmatprep.subr.bf16.mxu1 %v348_v0  ;;  %v347_v19 = vld [vmem:[%s445_s6] sm:$0xff]  }
   0x7   :  { %328 = vmatprep.subr.bf16.mxu0 %v348_v0  ;;  %v174_v21 = vld [vmem:[%s447_s1] sm:$0xf] }
   0x8   :  { %v294_v22 = vld [vmem:[%s448_s5] ss:$0 sm:$0xff] }
   0x9   :  { %317 = vmatmul.mubr.msk.bf16.vlgmr.msra.gmra.mrb[0].mxu0 %vm53_vm3, %v33_v9  ;;  %323 = vmatpush3.bf16.msra.mxu1 %v346_v11  ;;  %v301_v35 = vld [vmem:[%s449_s8] ss:$0 sm:$0xff] }
   0xa   :  { %329 = vmatpush3.bf16.msra.mxu0 %v184_v8  ;;  %330 = vmatprep.mubr.msk.bf16.mxu0 %vm350_vm2, %v348_v0 }
   0xb   :  { %334 = vmatprep.subr.bf16.mxu1 %v348_v0 }
  0x11   :  { %331 = vmatmul.mubr.msk.bf16.vlgmr.msra.gmra.mrb[4].mxu0 %vm176_vm5, %v174_v21 }
  0xdc   :  { %v95_v13 = vpop.f32.mrb[0].mxu0 }
  0xdd   :  { %v96_v14 = vadd.f32 %v290_v12, %v95_v13  ;;  %v318_v15 = vpop.f32.mrb[1].mxu0 }
  0xde   :  { %v98_v16 = vpop.f32.mrb[2].mxu0 }
  0xdf   :  { %v101_v17 = vmax.f32 %v96_v14, 0.0  ;;  %v319_v18 = vpop.f32.mrb[3].mxu0 }
  0xe1   :  { %v102_v20 = vpack.c.bf16 %v101_v17, %v101_v17 }
  0xe3   :  { %325 = vmatmul.mubr.msk.bf16.vlgmr.msra.gmra.mrb[0].mxu1 %vm126_vm4, %v102_v20 }
  0xe4   :  { %335 = vmatpush3.bf16.msra.mxu1 %v347_v19  ;;  %336 = vmatprep.mubr.msk.bf16.mxu1 %vm350_vm2, %v348_v0  ;;  %v220_v30 = vpop.f32.mrb[4].mxu0 }
  0xe5   :  { %v332_v31 = vpop.f32.mrb[5].mxu0 }
  0xe6   :  { %v223_v32 = vpop.f32.mrb[6].mxu0 }
  0xe7   :  { %v333_v33 = vpop.f32.mrb[7].mxu0 }
 0x1b6   :  { %v164_v23 = vpop.f32.mrb[0].mxu1 }
 0x1b7   :  { %v165_v24 = vadd.f32 %v294_v22, %v164_v23  ;;  %v326_v25 = vpop.f32.mrb[1].mxu1 }
 0x1b8   :  { %v167_v26 = vpop.f32.mrb[2].mxu1 }
 0x1b9   :  { %v170_v27 = vmax.f32 %v165_v24, 0.0  ;;  %v327_v28 = vpop.f32.mrb[3].mxu1 }
 0x1bb   :  { %v171_v29 = vpack.c.bf16 %v170_v27, %v170_v27 }
 0x1bd   :  { %337 = vmatmul.mubr.msk.bf16.vlgmr.msra.gmra.mrb[4].mxu1 %vm232_vm6, %v171_v29 }
 0x290   :  { %v270_v34 = vpop.f32.mrb[4].mxu1 }
 0x291   :  { %v271_v36 = vadd.f32 %v270_v34, %v220_v30  ;;  %v338_v37 = vpop.f32.mrb[5].mxu1 }
 0x292   :  { %v273_v38 = vpop.f32.mrb[6].mxu1 }
 0x293   :  { %v283_v39 = vadd.f32 %v301_v35, %v271_v36  ;;  %v339_v40 = vpop.f32.mrb[7].mxu1 }
 0x295   :  { %285 = vst.msk [vmem:[%s450_s9] sm:$0xff] %vm284_vm7, %v283_v39 }

</bundles_post_ra>
